<compile_context>
chip_gen: v6e
topology: v6e:2x2x1
jax: 0.10.0
libtpu: 0.0.40
codegen_flags: <defaults>
</compile_context>

<pallas_src>
import functools

import jax
import jax.numpy as jnp
from jax.experimental import pallas as pl
from jax.experimental.pallas import tpu as pltpu


def _label_predictor_kernel(x_ref, w_ref, b_ref, o_ref):
    # x_ref: (TB, C_in), w_ref: (C_in, C_out), b_ref: (1, C_out), o_ref: (TB, C_out)
    acc = jnp.dot(x_ref[...], w_ref[...], preferred_element_type=jnp.float32)
    o_ref[...] = (acc + b_ref[...]).astype(o_ref.dtype)


def init_label_predictor_params(key, num_subClasses=96, num_classes=8, std=0.02):
    """Matches nn.Linear + trunc_normal_(std=0.02, a=-2, b=2) + zero bias.

    PyTorch truncates at *absolute* +/-2 (~ +/-100 sigma for std=0.02), so
    truncate in sigma units at +/- 2/std before scaling by std.
    """
    w_key, _ = jax.random.split(key)
    weight = std * jax.random.truncated_normal(
        w_key, -2.0 / std, 2.0 / std, (num_classes, num_subClasses), dtype=jnp.float32
    )
    bias = jnp.zeros((num_classes,), dtype=jnp.float32)
    return weight, bias


def prepare_label_predictor_params(weight, bias):
    """One-time (hoisted) param prep: transpose to (C_in, C_out), bias -> (1, C_out).

    No 128-lane padding of C_out: the kernel writes an 8-wide output block (legal
    because it equals the full array dim), which is ~16x less HBM writeback than a
    padded slab and removes the external slice entirely.
    """
    return jnp.asarray(weight).T, jnp.asarray(bias).reshape(1, -1)


def _round_up(x, m):
    return ((x + m - 1) // m) * m


@functools.partial(jax.jit, static_argnames=("block_b", "gridless_max_b"))
def label_predictor_forward(concept_logits, w_t, b_row, block_b=4096,
                            gridless_max_b=1024):
    """
    concept_logits: (B, num_subClasses) float32
    w_t           : (num_subClasses, num_classes)  -- from prepare_label_predictor_params
    b_row         : (1, num_classes)
    returns       : (B, num_classes)   (float32; cast to bf16 here if the consumer tolerates it)
    """
    B, C_in = concept_logits.shape
    C_out = w_t.shape[1]
    itemsize = jnp.dtype(concept_logits.dtype).itemsize

    out_shape = jax.ShapeDtypeStruct((B, C_out), concept_logits.dtype)
    cost = pl.CostEstimate(
        flops=2 * B * C_in * C_out,
        transcendentals=0,
        bytes_accessed=B * (C_in + C_out) * itemsize
        + (C_in * C_out + C_out) * itemsize,
    )
    vmem = pltpu.MemorySpace.VMEM

    if B <= gridless_max_b:
        # Small batch: single block, no grid, everything VMEM-resident; one MXU pass.
        return pl.pallas_call(
            _label_predictor_kernel,
            out_shape=out_shape,
            in_specs=[
                pl.BlockSpec(memory_space=vmem),
                pl.BlockSpec(memory_space=vmem),
                pl.BlockSpec(memory_space=vmem),
            ],
            out_specs=pl.BlockSpec(memory_space=vmem),
            cost_estimate=cost,
        )(concept_logits, w_t, b_row)

    # Large batch: tile B; keep W / bias VMEM-resident across the grid via constant
    # index maps.  Cap the block so there are always >= 2 blocks (v7x megacore gets
    # both TensorCores); the partial final block is handled by Pallas (masked store),
    # no jnp.pad of the input needed.
    tb = min(block_b, _round_up(pl.cdiv(B, 2), 8))
    tb = max(8, tb)
    n_blocks = pl.cdiv(B, tb)
    return pl.pallas_call(
        _label_predictor_kernel,
        out_shape=out_shape,
        grid=(n_blocks,),
        in_specs=[
            pl.BlockSpec((tb, C_in), lambda i: (i, 0)),
            pl.BlockSpec((C_in, C_out), lambda i: (0, 0)),
            pl.BlockSpec((1, C_out), lambda i: (0, 0)),
        ],
        out_specs=pl.BlockSpec((tb, C_out), lambda i: (i, 0)),
        compiler_params=pltpu.CompilerParams(
            dimension_semantics=("parallel",),
        ),
        cost_estimate=cost,
    )(concept_logits, w_t, b_row)


if __name__ == "__main__":
    key = jax.random.PRNGKey(0)
    k_x, k_p = jax.random.split(key)

    B, num_subClasses, num_classes = 2, 96, 8
    concept_logits = jax.random.normal(k_x, (B, num_subClasses), dtype=jnp.float32)
    weight, bias = init_label_predictor_params(k_p, num_subClasses, num_classes)

    # One-time parameter preparation (hoisted out of the forward path).
    w_t, b_row = prepare_label_predictor_params(weight, bias)

    # Small-batch (grid-less) path.
    class_logits = label_predictor_forward(concept_logits, w_t, b_row)
    jax.block_until_ready(class_logits)
    ref = concept_logits @ weight.T + bias
    assert class_logits.shape == (B, num_classes)
    assert jnp.allclose(class_logits, ref, atol=1e-5, rtol=1e-5)

    # Large-batch (tiled, parallel-grid) path, non-multiple of the block size so the
    # partial final block (masked store, no jnp.pad) is exercised.
    B_big = 2600
    x_big = jax.random.normal(k_x, (B_big, num_subClasses), dtype=jnp.float32)
    out_big = label_predictor_forward(x_big, w_t, b_row, block_b=1024)
    jax.block_until_ready(out_big)
    ref_big = x_big @ weight.T + bias
    assert out_big.shape == (B_big, num_classes)
    assert jnp.allclose(out_big, ref_big, atol=1e-4, rtol=1e-4)

    print("KERNEL_OK")
</pallas_src>

<mosaic_0001>
module attributes {stable_mosaic.version = 11 : i64} {
  func.func @_label_predictor_kernel(%arg0: memref<2x96xf32, #tpu.memory_space<vmem>>, %arg1: memref<96x8xf32, #tpu.memory_space<vmem>>, %arg2: memref<1x8xf32, #tpu.memory_space<vmem>>, %arg3: memref<2x8xf32, #tpu.memory_space<vmem>>) attributes {dimension_semantics = [], scalar_prefetch = 0 : i64, scratch_operands = 0 : i64, tpu.core_type = #tpu.core_type<tc>} {
    %c0 = arith.constant 0 : index
    %c0_0 = arith.constant 0 : index
    %0 = vector.load %arg0[%c0, %c0_0] : memref<2x96xf32, #tpu.memory_space<vmem>>, vector<2x96xf32>
    %c0_1 = arith.constant 0 : index
    %c0_2 = arith.constant 0 : index
    %1 = vector.load %arg1[%c0_1, %c0_2] : memref<96x8xf32, #tpu.memory_space<vmem>>, vector<96x8xf32>
    %cst = arith.constant dense<0.000000e+00> : vector<2x8xf32>
    %2 = tpu.matmul %0, %1, %cst {dimension_numbers = #tpu.dot_dimension_numbers<[1], [0], [0], [1], [0, 0, 1, 1], [], []>} : vector<2x96xf32>, vector<96x8xf32>, vector<2x8xf32> -> vector<2x8xf32>
    %c0_3 = arith.constant 0 : index
    %c0_4 = arith.constant 0 : index
    %3 = vector.load %arg2[%c0_3, %c0_4] : memref<1x8xf32, #tpu.memory_space<vmem>>, vector<1x8xf32>
    %4 = vector.broadcast %3 : vector<1x8xf32> to vector<2x8xf32>
    %5 = arith.addf %2, %4 : vector<2x8xf32>
    %c0_5 = arith.constant 0 : index
    %c0_6 = arith.constant 0 : index
    %6 = vector.load %arg3[%c0_5, %c0_6] : memref<2x8xf32, #tpu.memory_space<vmem>>, vector<2x8xf32>
    tpu.vector_store %arg3[%c0_5, %c0_6], %5 {strides = array<i32>} : memref<2x8xf32, #tpu.memory_space<vmem>>, vector<2x8xf32>,
    return
  }
}

</mosaic_0001>

<bundles_post_ra>
// kernel: label_predictor_forward.1
= control target key start
LH: loop header
LB: loop body
LE: loop exit
PB: predicated region body
PF: predicated region fallthrough
CT: control target
= control target key end

     0   :  { %v192_v1 = vmov 0.0   ;;  %vm193_vm0 = vmmov 0   ;;  %s260_s0 = inlined_call_operand.vmem [shape: f32[2,96], index: 0, kind: input, shape index: {}]   ;;  %s261_s1 = inlined_call_operand.vmem [shape: f32[96,8], index: 1, kind: input, shape index: {}]   ;;  %s262_s2 = inlined_call_operand.vmem [shape: f32[1,8], index: 2, kind: input, shape index: {}]   ;;  %s263_s3 = inlined_call_operand.hbm [shape: f32[2,8], index: 3, kind: output, shape index: {}]  }
   0x1   :  { %v27_v0 = vld [vmem:[%s261_s1 + $0x58] sm:$0xff]  ;;  %140 = vmatprep.subr.mxu0 %v192_v1  ;;  %v26_v2 = vld [vmem:[%s261_s1 + $0x50] sm:$0xff]  ;;  %164 = vmatprep.mubr.msk.f32.mxu0 %vm193_vm0, %v192_v1  ;;  %v25_v3 = vld [vmem:[%s261_s1 + $0x48] sm:$0xff] }
   0x2   :  { %141 = vmatpush3.msra.mxu0 %v27_v0 }
   0x3   :  { %142 = vmatprep.subr.mxu0 %v192_v1 }
   0x4   :  { %143 = vmatpush3.msra.mxu0 %v26_v2 }
   0x5   :  { %8 = vsyncpa [#allocation3], 0  ;;  %144 = vmatprep.subr.mxu0 %v192_v1  ;;  %v24_v4 = vld [vmem:[%s261_s1 + $0x40] sm:$0xff]  ;;  %v23_v5 = vld [vmem:[%s261_s1 + $0x38] sm:$0xff]  ;;  %vm35_vm1 = vcmask 785408   ;;  %s194_s13 = smov [#allocation2]  }
   0x6   :  { %145 = vmatpush3.msra.mxu0 %v25_v3  ;;  %v22_v6 = vld [vmem:[%s261_s1 + $0x30] sm:$0xff]  ;;  %v21_v7 = vld [vmem:[%s261_s1 + $0x28] sm:$0xff]  ;;  %v20_v8 = vld [vmem:[%s261_s1 + $0x20] sm:$0xff]  ;;  %s117_s14 = sshll.u32 %s194_s13, 4  ;;  %vm109_vm2 = vcmask 58368   ;;  %s118_s14 = int_to_ptr.vmem [resolvable:$true] %s117_s14 }
   0x7   :  { %146 = vmatprep.subr.mxu0 %v192_v1  ;;  %v19_v9 = vld [vmem:[%s261_s1 + $0x18] sm:$0xff]  ;;  %v18_v10 = vld [vmem:[%s261_s1 + $0x10] sm:$0xff]  ;;  %v17_v11 = vld [vmem:[%s261_s1 + $0x8] sm:$0xff]  ;;  %p175_p1 = scmp.lt.s32.totalorder %s118_s14, %s118_s14 }
   0x8   :  { %147 = vmatpush3.msra.mxu0 %v24_v4  ;;  %v16_v12 = vld [vmem:[%s261_s1] sm:$0xff]  ;;  %s170_s1 = scalar_lea.vmem %s118_s14, 32 }
   0x9   :  { %148 = vmatprep.subr.mxu0 %v192_v1  ;;  %v15_v13 = vld [vmem:[%s260_s0] sm:$0x3]  ;;  %p171_p0 = scmp.ne.s32.totalorder %s118_s14, %s170_s1  ;;  %p176_p2 = scmp.lt.s32.totalorder %s170_s1, %s170_s1 }
   0xa   :  { %149 = vmatpush3.msra.mxu0 %v23_v5  ;;  %v125_v14 = vld [vmem:[%s262_s2] ss:$0 sm:$0xff] }
   0xb   :  { %150 = vmatprep.subr.mxu0 %v192_v1  ;;  %p177_p3 = por %p176_p2, %p175_p1 }
   0xc   :  { %151 = vmatpush3.msra.mxu0 %v22_v6 }
   0xd   :  { %152 = vmatprep.subr.mxu0 %v192_v1  ;;  %p178_p4 = pnand %p177_p3, %p171_p0 }
   0xe   :  { %153 = vmatpush3.msra.mxu0 %v21_v7 }
   0xf   :  { %154 = vmatprep.subr.mxu0 %v192_v1 }
  0x10   :  { %155 = vmatpush3.msra.mxu0 %v20_v8 }
  0x11   :  { %156 = vmatprep.subr.mxu0 %v192_v1 }
  0x12   :  { %157 = vmatpush3.msra.mxu0 %v19_v9 }
  0x13   :  { %158 = vmatprep.subr.mxu0 %v192_v1 }
  0x14   :  { %159 = vmatpush3.msra.mxu0 %v18_v10 }
  0x15   :  { %160 = vmatprep.subr.mxu0 %v192_v1 }
  0x16   :  { %161 = vmatpush3.msra.mxu0 %v17_v11 }
  0x17   :  { %162 = vmatprep.subr.mxu0 %v192_v1 }
  0x18   :  { %163 = vmatpush3.msra.mxu0 %v16_v12 }
  0x19   :  { %165 = vmatmul.mubr.msk.f32.vlgmr.msra.gmra.mxu0 %vm35_vm1, %v15_v13 }
  0xd9   :  { %v105_v15 = vpop.f32.mrf.mxu0 }
  0xda   :  { %v106_v16 = vadd.f32 %v125_v14, %v105_v15 }
  0xdb   :  { %v166_v17 = vpop.f32.mrf.mxu0 }
  0xdc   :  { %110 = vst.msk [vmem:[#allocation2] sm:$0x3] %vm109_vm2, %v106_v16 }
  0xdd   :  { %181 = shalt.err (!%p178_p4)
}
  0xde   :  { %120 = dma.vmem_to_hbm [thread:$0]  %s118_s14, 32, %s263_s3, [#allocation3]  }
  0xdf   :  { %190 = dma.done.wait [#allocation3], 32  }
  0xe0   :  { %191 = vsyncadd [#allocation3], 4294967264 }
  0xe1   :  { %124 = vsyncpa [#allocation3], 1 }

</bundles_post_ra>
